<compile_context>
chip_gen: v7x
topology: tpu7x:2x2x1
jax: 0.10.0
libtpu: 0.0.40
codegen_flags: <defaults>
</compile_context>

<pallas_src>
import functools

import jax
import jax.numpy as jnp
from jax.experimental import pallas as pl
from jax.experimental.pallas import tpu as pltpu


# ----------------------------------------------------------------------------
# Modulation kernel: out = gamma * x + beta, tiled over (rows, lanes)
# ----------------------------------------------------------------------------
def _modulate_kernel(x_ref, gb_ref, o_ref):
    # x_ref : (rt, lt)   gb_ref : (rt, 2)  -> column 0 = gamma, column 1 = beta
    g = gb_ref[:, 0:1]
    b = gb_ref[:, 1:2]
    x = x_ref[...].astype(jnp.float32)
    o_ref[...] = (g * x + b).astype(o_ref.dtype)


def _round_up(n, m):
    return ((n + m - 1) // m) * m


def _block_sizes(rows, lanes, itemsize, target_bytes=4 << 20, max_lt=2048):
    """Byte-budget block sizing: ~target_bytes per block, rt multiple of 8,
    lt multiple of 128; ragged edges are handled by the cdiv grid."""
    lt = min(_round_up(lanes, 128), max_lt)
    rt_budget = max(8, (target_bytes // (lt * itemsize)) // 8 * 8)
    rt = min(_round_up(rows, 8), rt_budget)
    return rt, lt


def _vmem_limit_bytes():
    """Generation-aware scoped-VMEM limit."""
    try:
        phys = pltpu.get_tpu_info().vmem_capacity_bytes
    except Exception:
        return 48 * 1024 * 1024
    if phys >= 128 * 1024 * 1024:      # v5e / v6e: plenty of physical VMEM
        return 64 * 1024 * 1024
    return 48 * 1024 * 1024            # v7x: 64 MiB physical, leave headroom


# ----------------------------------------------------------------------------
# gamma / beta MLPs (tiny; plain jnp, fused by XLA)
# ----------------------------------------------------------------------------
def _gamma_beta(y, p):
    y = y.astype(jnp.float32)
    hg = jnp.maximum(y @ p["wg1"] + p["bg1"], 0.0)
    gamma = hg @ p["wg2"] + p["bg2"]
    hb = jnp.maximum(y @ p["wb1"] + p["bb1"], 0.0)
    beta = hb @ p["wb2"] + p["bb2"]
    return gamma, beta                                   # each (B, F) f32


# ----------------------------------------------------------------------------
# Forward pass
# ----------------------------------------------------------------------------
def affine_forward(x, y, params, *, out_dtype=None):
    """x: (B, C, H, W) f32/bf16, y: (B, c_dim) or (c_dim,), params: see init."""
    if y.ndim == 1:
        y = y[None, :]
    B, C, H, W = x.shape
    F = params["wg2"].shape[0]
    assert F == C, "num_features must equal the channel count of x"
    HW = H * W
    out_dtype = x.dtype if out_dtype is None else out_dtype

    gamma, beta = _gamma_beta(y, params)                 # (B, C) each, f32
    gb = jnp.concatenate(
        [gamma.reshape(B * C, 1), beta.reshape(B * C, 1)], axis=1
    )                                                    # (B*C, 2) f32

    # Tiny spatial maps (< one lane group): masked partial stores would
    # dominate -> fall back to plain XLA (those tensors are tiny anyway).
    if HW < 128:
        out = gamma[:, :, None, None] * x.astype(jnp.float32) \
              + beta[:, :, None, None]
        return out.astype(out_dtype).reshape(B, C, H, W)

    rows = B * C
    x2 = x.reshape(rows, HW)
    itemsize = max(jnp.dtype(x.dtype).itemsize, jnp.dtype(out_dtype).itemsize)
    rt, lt = _block_sizes(rows, HW, itemsize)
    grid = (pl.cdiv(rows, rt), pl.cdiv(HW, lt))          # rows leading (v7x 2-TC)

    out = pl.pallas_call(
        _modulate_kernel,
        out_shape=jax.ShapeDtypeStruct((rows, HW), out_dtype),
        grid=grid,
        in_specs=[
            pl.BlockSpec((rt, lt), lambda i, j: (i, j)),   # x tile
            pl.BlockSpec((rt, 2), lambda i, j: (i, 0)),    # merged gamma/beta
        ],
        out_specs=pl.BlockSpec((rt, lt), lambda i, j: (i, j)),
        compiler_params=pltpu.CompilerParams(
            dimension_semantics=("parallel", "parallel"),
            vmem_limit_bytes=_vmem_limit_bytes(),
        ),
    )(x2, gb)

    return out.reshape(B, C, H, W)


# ----------------------------------------------------------------------------
# Parameter handling (weights stored as (in, out) so we compute y @ W + b)
# ----------------------------------------------------------------------------
def init_params(key, c_dim, num_features):
    """Deterministic init matching Affine._initialize()."""
    k1, k2, k3, k4 = jax.random.split(key, 4)
    scale = 1.0 / jnp.sqrt(jnp.float32(c_dim))
    return {
        # fc_gamma.fc1 : random (PyTorch default-style) init
        "wg1": jax.random.normal(k1, (c_dim, num_features), jnp.float32) * scale,
        "bg1": jax.random.normal(k2, (1, num_features), jnp.float32) * scale,
        # fc_gamma.fc2 : zeros weight, ones bias  (per _initialize)
        "wg2": jnp.zeros((num_features, num_features), jnp.float32),
        "bg2": jnp.ones((1, num_features), jnp.float32),
        # fc_beta.fc1 : random init
        "wb1": jax.random.normal(k3, (c_dim, num_features), jnp.float32) * scale,
        "bb1": jax.random.normal(k4, (1, num_features), jnp.float32) * scale,
        # fc_beta.fc2 : zeros weight, zeros bias  (per _initialize)
        "wb2": jnp.zeros((num_features, num_features), jnp.float32),
        "bb2": jnp.zeros((1, num_features), jnp.float32),
    }


def affine_reference(x, y, p):
    """Pure-JAX reference matching the PyTorch forward."""
    if y.ndim == 1:
        y = y[None, :]
    hg = jnp.maximum(y @ p["wg1"] + p["bg1"], 0.0)
    gamma = hg @ p["wg2"] + p["bg2"]
    hb = jnp.maximum(y @ p["wb1"] + p["bb1"], 0.0)
    beta = hb @ p["wb2"] + p["bb2"]
    return gamma[:, :, None, None] * x.astype(jnp.float32) + beta[:, :, None, None]


if __name__ == "__main__":
    B, C, H, W = 2, 4, 16, 16       # num_features == C (channels of x)
    c_dim = 32

    key = jax.random.PRNGKey(0)
    kx, ky, kp = jax.random.split(key, 3)
    x = jax.random.normal(kx, (B, C, H, W), jnp.float32)
    y = jax.random.normal(ky, (B, c_dim), jnp.float32)

    # 1) exact PyTorch initialization (fc2 weights zero -> gamma=1, beta=0)
    params = init_params(kp, c_dim, C)
    fwd = jax.jit(functools.partial(affine_forward))
    out = jax.block_until_ready(fwd(x, y, params))
    ref = affine_reference(x, y, params)
    assert out.shape == (B, C, H, W)
    assert jnp.allclose(out, ref, atol=1e-5, rtol=1e-5), "mismatch (init params)"

    # 2) non-trivial second-layer weights (post-training state)
    k5, k6, k7, k8 = jax.random.split(jax.random.PRNGKey(1), 4)
    params2 = dict(params)
    params2["wg2"] = jax.random.normal(k5, (C, C), jnp.float32) * 0.1
    params2["bg2"] = jax.random.normal(k6, (1, C), jnp.float32) * 0.1
    params2["wb2"] = jax.random.normal(k7, (C, C), jnp.float32) * 0.1
    params2["bb2"] = jax.random.normal(k8, (1, C), jnp.float32) * 0.1
    out2 = jax.block_until_ready(fwd(x, y, params2))
    ref2 = affine_reference(x, y, params2)
    assert jnp.allclose(out2, ref2, atol=1e-5, rtol=1e-5), "mismatch (trained params)"

    # 3) reduced-precision I/O path (bf16 in / bf16 out, f32 math inside)
    out_bf = jax.block_until_ready(fwd(x.astype(jnp.bfloat16), y, params2))
    assert out_bf.dtype == jnp.bfloat16
    assert jnp.allclose(out_bf.astype(jnp.float32), ref2, atol=5e-2, rtol=5e-2), \
        "mismatch (bf16 I/O)"

    # 4) tiny spatial map (< 128 lanes) -> XLA fallback path
    x_small = jax.random.normal(kx, (B, C, 4, 4), jnp.float32)
    out_s = jax.block_until_ready(affine_forward(x_small, y, params2))
    ref_s = affine_reference(x_small, y, params2)
    assert jnp.allclose(out_s, ref_s, atol=1e-5, rtol=1e-5), "mismatch (small map)"

    print("KERNEL_OK")
</pallas_src>

<mosaic_0001>
module attributes {stable_mosaic.version = 11 : i64} {
  func.func @_modulate_kernel(%arg0: i32, %arg1: i32, %arg2: memref<8x256xf32, #tpu.memory_space<vmem>>, %arg3: memref<8x2xf32, #tpu.memory_space<vmem>>, %arg4: memref<8x256xf32, #tpu.memory_space<vmem>>) attributes {dimension_semantics = [#tpu.dimension_semantics<parallel>, #tpu.dimension_semantics<parallel>], iteration_bounds = array<i64: 1, 1>, scalar_prefetch = 0 : i64, scratch_operands = 0 : i64, tpu.core_type = #tpu.core_type<tc>, window_params = [{transform_indices = @transform_0, window_bounds = array<i64: 8, 256>}, {transform_indices = @transform_1, window_bounds = array<i64: 8, 2>}, {transform_indices = @transform_2, window_bounds = array<i64: 8, 256>}]} {
    %c0 = arith.constant 0 : index
    %c0_0 = arith.constant 0 : index
    %0 = vector.load %arg3[%c0, %c0_0] : memref<8x2xf32, #tpu.memory_space<vmem>>, vector<8x1xf32>
    %c0_1 = arith.constant 0 : index
    %c1 = arith.constant 1 : index
    %1 = vector.load %arg3[%c0_1, %c1] : memref<8x2xf32, #tpu.memory_space<vmem>>, vector<8x1xf32>
    %c0_2 = arith.constant 0 : index
    %c0_3 = arith.constant 0 : index
    %2 = vector.load %arg2[%c0_2, %c0_3] : memref<8x256xf32, #tpu.memory_space<vmem>>, vector<8x256xf32>
    %3 = vector.broadcast %0 : vector<8x1xf32> to vector<8x256xf32>
    %4 = arith.mulf %3, %2 : vector<8x256xf32>
    %5 = vector.broadcast %1 : vector<8x1xf32> to vector<8x256xf32>
    %6 = arith.addf %4, %5 : vector<8x256xf32>
    %c0_4 = arith.constant 0 : index
    %c0_5 = arith.constant 0 : index
    %7 = vector.load %arg4[%c0_4, %c0_5] : memref<8x256xf32, #tpu.memory_space<vmem>>, vector<8x256xf32>
    tpu.vector_store %arg4[%c0_4, %c0_5], %6 {strides = array<i32>} : memref<8x256xf32, #tpu.memory_space<vmem>>, vector<8x256xf32>,
    return
  }
  func.func @transform_0(%arg0: i32, %arg1: i32) -> (i32, i32) {
    %c0_i32 = arith.constant 0 : i32
    return %arg0, %arg1 : i32, i32
  }
  func.func @transform_1(%arg0: i32, %arg1: i32) -> (i32, i32) {
    %c0_i32 = arith.constant 0 : i32
    %c0_i32_0 = arith.constant 0 : i32
    return %arg0, %c0_i32 : i32, i32
  }
  func.func @transform_2(%arg0: i32, %arg1: i32) -> (i32, i32) {
    %c0_i32 = arith.constant 0 : i32
    return %arg0, %arg1 : i32, i32
  }
}

</mosaic_0001>

<bundles_post_ra>
// kernel: affine_forward.1
= control target key start
LH: loop header
LB: loop body
LE: loop exit
PB: predicated region body
PF: predicated region fallthrough
CT: control target
= control target key end

     0   :  { %v37_v0 = vmov 0   ;;  %v38_v2 = vmov 1   ;;  %s69_s1 = inlined_call_operand.vmem [shape: f32[8,2], index: 1, kind: input, shape index: {}]   ;;  %s70_s0 = inlined_call_operand.vmem [shape: f32[8,256], index: 0, kind: input, shape index: {}]   ;;  %s71_s2 = inlined_call_operand.vmem [shape: f32[8,256], index: 2, kind: output, shape index: {}]  }
   0x1   :  { %35 = vset.pattern.permute.xlu0 %v37_v0  ;;  %v11_v1 = vld [vmem:[%s69_s1] sm:$0xff]  ;;  %v13_v5 = vld [vmem:[%s70_s0 + $0x8] sm:$0xff] }
   0x2   :  { %16 = vperm.xlu0 %35, %v11_v1   ;;  %v12_v4 = vld [vmem:[%s70_s0] sm:$0xff] }
   0x6   :  { %36 = vset.pattern.permute.xlu0 %v38_v2 }
   0x7   :  { %22 = vperm.xlu0 %36, %v11_v1  }
  0x81   :  { %v17_v3 = vpop.permute.xlu0 %16 }
  0x82   :  { %v19_v6 = vmul.f32 %v17_v3, %v12_v4  ;;  %v20_v7 = vmul.f32 %v17_v3, %v13_v5 }
  0x86   :  { %v23_v8 = vpop.permute.xlu0 %22 }
  0x87   :  { %v25_v9 = vadd.f32 %v23_v8, %v19_v6  ;;  %v26_v10 = vadd.f32 %v23_v8, %v20_v7 }
  0x89   :  { %27 = vst [vmem:[%s71_s2] sm:$0xff] %v25_v9  ;;  %28 = vst [vmem:[%s71_s2 + $0x8] sm:$0xff] %v26_v10 }

</bundles_post_ra>
